<compile_context>
chip_gen: v7x
topology: tpu7x:2x2x1
jax: 0.10.0
libtpu: 0.0.40
codegen_flags: <defaults>
</compile_context>

<pallas_src>
import jax
import jax.numpy as jnp
from jax import lax
from jax.experimental import pallas as pl
from jax.experimental.pallas import tpu as pltpu


def mlp_kernel(x_ref, w1_ref, b1_ref, w2_ref, b2_ref, w3_ref, b3_ref, o_ref):
    x = x_ref[...]                                   # (TB, 22)
    # firstLayer + ReLU, transposed: h1_t = W1 @ x.T -> (30, TB)
    # (NT matmul: contract the last dim of both operands — same pattern as Q @ K^T.)
    h1 = lax.dot_general(w1_ref[...], x, (((1,), (1,)), ((), ())),
                         preferred_element_type=jnp.float32)
    h1 = jnp.maximum(h1 + b1_ref[...], 0.0)          # bias (30, 1) broadcasts over lanes
    # secondLayer + ReLU: (10, 30) @ (30, TB) -> (10, TB)
    h2 = jnp.dot(w2_ref[...], h1, preferred_element_type=jnp.float32)
    h2 = jnp.maximum(h2 + b2_ref[...], 0.0)
    # finalLayer (no activation): (2, 10) @ (10, TB) -> (2, TB), lane-dense output block
    o = jnp.dot(w3_ref[...], h2, preferred_element_type=jnp.float32)
    o_ref[...] = (o + b3_ref[...]).astype(o_ref.dtype)


def _round_up(n, m):
    return ((n + m - 1) // m) * m


def node_network_forward(x, params, *, tb_max=4096):
    """x: (B, 22) float32. params: PyTorch-layout tuples (W (out,in), b (out,1))."""
    w1, b1, w2, b2, w3, b3 = params
    B, F = x.shape
    assert F == 22

    # Batch tile choice: single full tile for small batches, else TB = tb_max
    # (tb_max is a multiple of 8 and 128, so all BlockSpec divisibility rules hold).
    b_pad8 = _round_up(B, 8)
    tb = b_pad8 if b_pad8 <= tb_max else tb_max
    b_pad = _round_up(B, tb)
    if b_pad != B:
        x = jnp.pad(x, ((0, b_pad - B), (0, 0)))     # zero-pad remainder batch rows

    grid = (b_pad // tb,)
    n_weight_elems = 30 * 22 + 30 + 10 * 30 + 10 + 2 * 10 + 2

    out_t = pl.pallas_call(
        mlp_kernel,
        out_shape=jax.ShapeDtypeStruct((2, b_pad), jnp.float32),
        grid_spec=pltpu.PrefetchScalarGridSpec(
            num_scalar_prefetch=0,
            grid=grid,
            in_specs=[
                pl.BlockSpec((tb, 22), lambda i: (i, 0)),   # x: streamed per batch tile
                pl.BlockSpec((30, 22), lambda i: (0, 0)),   # weights/biases: resident
                pl.BlockSpec((30, 1), lambda i: (0, 0)),
                pl.BlockSpec((10, 30), lambda i: (0, 0)),
                pl.BlockSpec((10, 1), lambda i: (0, 0)),
                pl.BlockSpec((2, 10), lambda i: (0, 0)),
                pl.BlockSpec((2, 1), lambda i: (0, 0)),
            ],
            out_specs=pl.BlockSpec((2, tb), lambda i: (0, i)),
        ),
        compiler_params=pltpu.CompilerParams(
            dimension_semantics=("parallel",),   # batch tiles shard across TCs on v7x
            vmem_limit_bytes=32 * 1024 * 1024,
        ),
        cost_estimate=pl.CostEstimate(
            flops=2 * b_pad * (22 * 30 + 30 * 10 + 10 * 2),
            transcendentals=0,
            bytes_accessed=4 * (b_pad * 22 + b_pad * 2 + n_weight_elems),
        ),
    )(x, w1, b1, w2, b2, w3, b3)

    # (2, B_pad) lane-dense kernel output -> (B, 2); tiny XLA transpose in the wrapper.
    return out_t[:, :B].T


def init_params(key):
    # Deterministic init mimicking nn.Linear's uniform(-1/sqrt(fan_in), 1/sqrt(fan_in)).
    # Weights in PyTorch's (out_features, in_features) layout; biases as (out, 1) columns.
    def linear(key, fan_in, fan_out):
        kw, kb = jax.random.split(key)
        bound = 1.0 / jnp.sqrt(float(fan_in))
        w = jax.random.uniform(kw, (fan_out, fan_in), jnp.float32, -bound, bound)
        b = jax.random.uniform(kb, (fan_out, 1), jnp.float32, -bound, bound)
        return w, b

    k1, k2, k3 = jax.random.split(key, 3)
    w1, b1 = linear(k1, 22, 30)
    w2, b2 = linear(k2, 30, 10)
    w3, b3 = linear(k3, 10, 2)
    return (w1, b1, w2, b2, w3, b3)


def reference_forward(x, params):
    w1, b1, w2, b2, w3, b3 = params
    h1 = jnp.maximum(x @ w1.T + b1.T, 0.0)
    h2 = jnp.maximum(h1 @ w2.T + b2.T, 0.0)
    return h2 @ w3.T + b3.T


if __name__ == "__main__":
    key = jax.random.PRNGKey(0)
    kp, kx = jax.random.split(key)
    params = init_params(kp)

    # Small batch; also exercises the remainder-padding path (6 -> padded to 8).
    batch = 6
    x = jax.random.normal(kx, (batch, 22), dtype=jnp.float32)

    out = node_network_forward(x, params)
    out = jax.block_until_ready(out)

    ref = reference_forward(x, params)
    assert out.shape == (batch, 2)
    assert jnp.allclose(out, ref, atol=1e-5, rtol=1e-5), float(jnp.max(jnp.abs(out - ref)))

    # Also exercise the multi-tile (grid > 1) path with a batch larger than one tile.
    batch2 = 9000
    x2 = jax.random.normal(kx, (batch2, 22), dtype=jnp.float32)
    out2 = jax.block_until_ready(node_network_forward(x2, params))
    ref2 = reference_forward(x2, params)
    assert out2.shape == (batch2, 2)
    assert jnp.allclose(out2, ref2, atol=1e-4, rtol=1e-4), float(jnp.max(jnp.abs(out2 - ref2)))

    print("KERNEL_OK")
</pallas_src>

<mosaic_0001>
module attributes {stable_mosaic.version = 11 : i64} {
  func.func @mlp_kernel(%arg0: i32, %arg1: memref<8x22xf32, #tpu.memory_space<vmem>>, %arg2: memref<30x22xf32, #tpu.memory_space<vmem>>, %arg3: memref<30x1xf32, #tpu.memory_space<vmem>>, %arg4: memref<10x30xf32, #tpu.memory_space<vmem>>, %arg5: memref<10x1xf32, #tpu.memory_space<vmem>>, %arg6: memref<2x10xf32, #tpu.memory_space<vmem>>, %arg7: memref<2x1xf32, #tpu.memory_space<vmem>>, %arg8: memref<2x8xf32, #tpu.memory_space<vmem>>) attributes {dimension_semantics = [#tpu.dimension_semantics<parallel>], iteration_bounds = array<i64: 1>, scalar_prefetch = 0 : i64, scratch_operands = 0 : i64, tpu.core_type = #tpu.core_type<tc>, window_params = [{transform_indices = @transform_0, window_bounds = array<i64: 8, 22>}, {pipeline_mode = #tpu.pipeline_mode<synchronous>, transform_indices = @transform_1, window_bounds = array<i64: 30, 22>}, {pipeline_mode = #tpu.pipeline_mode<synchronous>, transform_indices = @transform_2, window_bounds = array<i64: 30, 1>}, {pipeline_mode = #tpu.pipeline_mode<synchronous>, transform_indices = @transform_3, window_bounds = array<i64: 10, 30>}, {pipeline_mode = #tpu.pipeline_mode<synchronous>, transform_indices = @transform_4, window_bounds = array<i64: 10, 1>}, {pipeline_mode = #tpu.pipeline_mode<synchronous>, transform_indices = @transform_5, window_bounds = array<i64: 2, 10>}, {pipeline_mode = #tpu.pipeline_mode<synchronous>, transform_indices = @transform_6, window_bounds = array<i64: 2, 1>}, {transform_indices = @transform_7, window_bounds = array<i64: 2, 8>}]} {
    %c0 = arith.constant 0 : index
    %c0_0 = arith.constant 0 : index
    %0 = vector.load %arg1[%c0, %c0_0] : memref<8x22xf32, #tpu.memory_space<vmem>>, vector<8x22xf32>
    %c0_1 = arith.constant 0 : index
    %c0_2 = arith.constant 0 : index
    %1 = vector.load %arg2[%c0_1, %c0_2] : memref<30x22xf32, #tpu.memory_space<vmem>>, vector<30x22xf32>
    %cst = arith.constant dense<0.000000e+00> : vector<30x8xf32>
    %2 = tpu.matmul %1, %0, %cst {dimension_numbers = #tpu.dot_dimension_numbers<[1], [1], [0], [0], [0, 0, 1, 0], [], []>} : vector<30x22xf32>, vector<8x22xf32>, vector<30x8xf32> -> vector<30x8xf32>
    %c0_3 = arith.constant 0 : index
    %c0_4 = arith.constant 0 : index
    %3 = vector.load %arg3[%c0_3, %c0_4] : memref<30x1xf32, #tpu.memory_space<vmem>>, vector<30x1xf32>
    %4 = vector.broadcast %3 : vector<30x1xf32> to vector<30x8xf32>
    %5 = arith.addf %2, %4 : vector<30x8xf32>
    %cst_5 = arith.constant 0.000000e+00 : f32
    %6 = vector.broadcast %cst_5 : f32 to vector<30x8xf32>
    %7 = arith.maximumf %5, %6 : vector<30x8xf32>
    %c0_6 = arith.constant 0 : index
    %c0_7 = arith.constant 0 : index
    %8 = vector.load %arg4[%c0_6, %c0_7] : memref<10x30xf32, #tpu.memory_space<vmem>>, vector<10x30xf32>
    %cst_8 = arith.constant dense<0.000000e+00> : vector<10x8xf32>
    %9 = tpu.matmul %8, %7, %cst_8 {dimension_numbers = #tpu.dot_dimension_numbers<[1], [0], [0], [1], [0, 0, 1, 1], [], []>} : vector<10x30xf32>, vector<30x8xf32>, vector<10x8xf32> -> vector<10x8xf32>
    %c0_9 = arith.constant 0 : index
    %c0_10 = arith.constant 0 : index
    %10 = vector.load %arg5[%c0_9, %c0_10] : memref<10x1xf32, #tpu.memory_space<vmem>>, vector<10x1xf32>
    %11 = vector.broadcast %10 : vector<10x1xf32> to vector<10x8xf32>
    %12 = arith.addf %9, %11 : vector<10x8xf32>
    %cst_11 = arith.constant 0.000000e+00 : f32
    %13 = vector.broadcast %cst_11 : f32 to vector<10x8xf32>
    %14 = arith.maximumf %12, %13 : vector<10x8xf32>
    %c0_12 = arith.constant 0 : index
    %c0_13 = arith.constant 0 : index
    %15 = vector.load %arg6[%c0_12, %c0_13] : memref<2x10xf32, #tpu.memory_space<vmem>>, vector<2x10xf32>
    %cst_14 = arith.constant dense<0.000000e+00> : vector<2x8xf32>
    %16 = tpu.matmul %15, %14, %cst_14 {dimension_numbers = #tpu.dot_dimension_numbers<[1], [0], [0], [1], [0, 0, 1, 1], [], []>} : vector<2x10xf32>, vector<10x8xf32>, vector<2x8xf32> -> vector<2x8xf32>
    %c0_15 = arith.constant 0 : index
    %c0_16 = arith.constant 0 : index
    %17 = vector.load %arg7[%c0_15, %c0_16] : memref<2x1xf32, #tpu.memory_space<vmem>>, vector<2x1xf32>
    %18 = vector.broadcast %17 : vector<2x1xf32> to vector<2x8xf32>
    %19 = arith.addf %16, %18 : vector<2x8xf32>
    %c0_17 = arith.constant 0 : index
    %c0_18 = arith.constant 0 : index
    %20 = vector.load %arg8[%c0_17, %c0_18] : memref<2x8xf32, #tpu.memory_space<vmem>>, vector<2x8xf32>
    tpu.vector_store %arg8[%c0_17, %c0_18], %19 {strides = array<i32>} : memref<2x8xf32, #tpu.memory_space<vmem>>, vector<2x8xf32>,
    return
  }
  func.func @transform_0(%arg0: i32) -> (i32, i32) {
    %c0_i32 = arith.constant 0 : i32
    %c0_i32_0 = arith.constant 0 : i32
    return %arg0, %c0_i32 : i32, i32
  }
  func.func @transform_1(%arg0: i32) -> (i32, i32) {
    %c0_i32 = arith.constant 0 : i32
    %c0_i32_0 = arith.constant 0 : i32
    %c0_i32_1 = arith.constant 0 : i32
    return %c0_i32, %c0_i32_0 : i32, i32
  }
  func.func @transform_2(%arg0: i32) -> (i32, i32) {
    %c0_i32 = arith.constant 0 : i32
    %c0_i32_0 = arith.constant 0 : i32
    %c0_i32_1 = arith.constant 0 : i32
    return %c0_i32, %c0_i32_0 : i32, i32
  }
  func.func @transform_3(%arg0: i32) -> (i32, i32) {
    %c0_i32 = arith.constant 0 : i32
    %c0_i32_0 = arith.constant 0 : i32
    %c0_i32_1 = arith.constant 0 : i32
    return %c0_i32, %c0_i32_0 : i32, i32
  }
  func.func @transform_4(%arg0: i32) -> (i32, i32) {
    %c0_i32 = arith.constant 0 : i32
    %c0_i32_0 = arith.constant 0 : i32
    %c0_i32_1 = arith.constant 0 : i32
    return %c0_i32, %c0_i32_0 : i32, i32
  }
  func.func @transform_5(%arg0: i32) -> (i32, i32) {
    %c0_i32 = arith.constant 0 : i32
    %c0_i32_0 = arith.constant 0 : i32
    %c0_i32_1 = arith.constant 0 : i32
    return %c0_i32, %c0_i32_0 : i32, i32
  }
  func.func @transform_6(%arg0: i32) -> (i32, i32) {
    %c0_i32 = arith.constant 0 : i32
    %c0_i32_0 = arith.constant 0 : i32
    %c0_i32_1 = arith.constant 0 : i32
    return %c0_i32, %c0_i32_0 : i32, i32
  }
  func.func @transform_7(%arg0: i32) -> (i32, i32) {
    %c0_i32 = arith.constant 0 : i32
    %c0_i32_0 = arith.constant 0 : i32
    return %c0_i32, %arg0 : i32, i32
  }
}

</mosaic_0001>

<bundles_post_ra>
// kernel: tpu_custom_call.1
= control target key start
LH: loop header
LB: loop body
LE: loop exit
PB: predicated region body
PF: predicated region fallthrough
CT: control target
= control target key end

     0   :  { %vm56_vm0 = vcmask 179200   ;;  %v460_v4 = vmov 0   ;;  %s573_s0 = inlined_call_operand.vmem [shape: f32[8,22], index: 0, kind: input, shape index: {}]   ;;  %s574_s1 = inlined_call_operand.vmem [shape: f32[30,22], index: 1, kind: input, shape index: {}]   ;;  %s575_s2 = inlined_call_operand.vmem [shape: f32[30,1], index: 2, kind: input, shape index: {}]   ;;  %s576_s3 = inlined_call_operand.vmem [shape: f32[10,30], index: 3, kind: input, shape index: {}]   ;;  %s577_s4 = inlined_call_operand.vmem [shape: f32[10,1], index: 4, kind: input, shape index: {}]   ;;  %s578_s5 = inlined_call_operand.vmem [shape: f32[2,10], index: 5, kind: input, shape index: {}]   ;;  %s579_s6 = inlined_call_operand.vmem [shape: f32[2,1], index: 6, kind: input, shape index: {}]   ;;  %s580_s7 = inlined_call_operand.hbm [shape: f32[2,8], index: 7, kind: output, shape index: {}]  }
   0x1   :  { %v27_v0 = vld [vmem:[%s573_s0] sm:$0xff]  ;;  %v29_v3 = vld [vmem:[%s574_s1 + $0x8] sm:$0xff]  ;;  %434 = vset.pattern.permute.xlu0 %v460_v4  ;;  %v34_v5 = vld [vmem:[%s575_s2 + $0x10] sm:$0xff]  ;;  %435 = vset.pattern.permute.xlu1 %v460_v4 }
   0x2   :  { %v28_v1 = vld [vmem:[%s574_s1] sm:$0xff]  ;;  %388 = vmatprep.subr.msk.mxu0 %vm56_vm0, %v27_v0  ;;  %v30_v6 = vld [vmem:[%s574_s1 + $0x10] sm:$0xff]  ;;  %v33_v7 = vld [vmem:[%s575_s2 + $0x8] sm:$0xff]  ;;  %48 = vperm.xlu1 %435, %v34_v5  }
   0x3   :  { %390 = vmatprep.mubr.msk.f32.mxu0 %vm56_vm0, %v28_v1  ;;  %v32_v2 = vld [vmem:[%s575_s2] sm:$0xff]  ;;  %389 = vmatpush3.xpose.msk.msra.mxu0 %vm56_vm0, %v27_v0 }
   0x4   :  { %38 = vperm.xlu0 %434, %v32_v2  }
   0x5   :  { %12 = vsyncpa [#allocation3], 0  ;;  %v35_v8 = vld [vmem:[%s575_s2 + $0x18] sm:$0x3f]  ;;  %v163_v10 = vld [vmem:[%s577_s4] sm:$0xff]  ;;  %vm175_vm1 = vcmask 244736  }
   0x6   :  { %391 = vmatmul.mubr.msk.f32.vlgmr.msra.gmra.mrb[0].mxu0 %vm56_vm0, %v29_v3  ;;  %v31_v9 = vld [vmem:[%s574_s1 + $0x18] sm:$0x3f]  ;;  %53 = vperm.xlu1 %435, %v35_v8   ;;  %v164_v11 = vld [vmem:[%s577_s4 + $0x8] sm:$0x3]  ;;  %v264_v12 = vld [vmem:[%s579_s6] sm:$0x3] }
   0x7   :  { %393 = vmatprep.mubr.msk.f32.mxu0 %vm56_vm0, %v30_v6  ;;  %v161_v13 = vld [vmem:[%s576_s3] sm:$0xff]  ;;  %vm182_vm2 = vcmask 1045504   ;;  %vm461_vm3 = vmmov 1   ;;  %v162_v32 = vld [vmem:[%s576_s3 + $0x8] sm:$0x3]  ;;  %v462_v33 = vmov 0.0|0.0  }
   0x8   :  { %43 = vperm.xlu0 %434, %v33_v7   ;;  %404 = vmatprep.mubr.msk.f32.mxu1 %vm175_vm1, %v161_v13  ;;  %vm419_vm4 = vmpackc.low %vm182_vm2, %vm461_vm3  ;;  %vm463_vm5 = vmmov 0   ;;  %v464_v34 = vmov 0.0   ;;  %vm274_vm6 = vcmask 1041408   ;;  %v263_v44 = vld [vmem:[%s578_s5] sm:$0x3]  ;;  %vm270_vm8 = vcmask 80896  }
   0x9   :  { %424 = vmatprep.subr.bf16.mxu0 %v462_v33  ;;  %vm426_vm7 = vmpackc.low %vm274_vm6, %vm461_vm3  ;;  %s465_s25 = smov [#allocation2]   ;;  %vm348_vm9 = vcmask 58368  }
   0xa   :  { %394 = vmatmul.mubr.msk.f32.gmra.mrb[2].mxu0 %vm56_vm0, %v31_v9  ;;  %172 = vperm.xlu1 %435, %v164_v11   ;;  %s356_s26 = sshll.u32 %s465_s25, 4  ;;  %s357_s26 = int_to_ptr.vmem [resolvable:$true] %s356_s26 }
   0xb   :  { %411 = vmatprep.mubr.msk.f32.mxu0 %vm463_vm5, %v464_v34  ;;  %s436_s27 = scalar_lea.vmem %s357_s26, 32  ;;  %p441_p1 = scmp.lt.s32.totalorder %s357_s26, %s357_s26 }
   0xc   :  { %167 = vperm.xlu0 %434, %v163_v10   ;;  %p437_p0 = scmp.ne.s32.totalorder %s357_s26, %s436_s27  ;;  %p442_p2 = scmp.lt.s32.totalorder %s436_s27, %s436_s27 }
   0xe   :  { %p443_p3 = por %p442_p2, %p441_p1 }
  0x10   :  { %267 = vperm.xlu0 %434, %v264_v12   ;;  %p444_p4 = pnand %p443_p3, %p437_p0 }
  0x81   :  { %v49_v15 = vpop.permute.xlu1 %48 }
  0x83   :  { %v39_v14 = vpop.permute.xlu0 %38 }
  0x85   :  { %v54_v22 = vpop.permute.xlu1 %53 }
  0x87   :  { %v44_v16 = vpop.permute.xlu0 %43 }
  0x89   :  { %v173_v35 = vpop.permute.xlu1 %172 }
  0x8b   :  { %v168_v37 = vpop.permute.xlu0 %167 }
  0x8f   :  { %v268_v45 = vpop.permute.xlu0 %267 }
  0xd9   :  { %v392_v17 = vpop.f32.mrb[0].mxu0 }
  0xda   :  { %v144_v18 = vadd.f32 %v392_v17, %v44_v16  ;;  %v138_v19 = vpop.f32.mrb[1].mxu0 }
  0xdb   :  { %v139_v20 = vadd.f32 %v138_v19, %v39_v14 }
  0xdc   :  { %v158_v21 = vmax.f32 %v144_v18, 0.0 }
  0xdd   :  { %v157_v23 = vmax.f32 %v139_v20, 0.0  ;;  %v395_v24 = vpop.f32.mrb[2].mxu0 }
  0xde   :  { %v154_v25 = vadd.f32 %v395_v24, %v54_v22  ;;  %v148_v26 = vpop.f32.mrb[3].mxu0 }
  0xdf   :  { %v149_v27 = vadd.f32 %v148_v26, %v49_v15  ;;  %v414_v28 = vpack.c.bf16 %v158_v21, %v157_v23 }
  0xe0   :  { %v160_v29 = vmax.f32 %v154_v25, 0.0 }
  0xe1   :  { %v159_v30 = vmax.f32 %v149_v27, 0.0  ;;  %415 = vmatprep.subr.bf16.mxu1 %v414_v28 }
  0xe2   :  { %417 = vmatpush3.bf16.msra.mxu1 %v414_v28 }
  0xe3   :  { %v418_v31 = vpack.c.bf16 %v160_v29, %v159_v30 }
  0xe5   :  { %420 = vmatprep.subr.msk.bf16.mxu1 %vm419_vm4, %v418_v31 }
  0xe6   :  { %423 = vmatpush3.bf16.msk.msra.mxu1 %vm419_vm4, %v418_v31 }
  0xe9   :  { %405 = vmatmul.mubr.msk.f32.vlgmr.msra.gmra.mrb[0].mxu1 %vm175_vm1, %v162_v32 }
 0x1bc   :  { %v406_v36 = vpop.f32.mrb[0].mxu1 }
 0x1bd   :  { %v258_v38 = vadd.f32 %v406_v36, %v173_v35  ;;  %v252_v39 = vpop.f32.mrb[1].mxu1 }
 0x1be   :  { %v253_v40 = vadd.f32 %v252_v39, %v168_v37 }
 0x1bf   :  { %v262_v41 = vmax.f32 %v258_v38, 0.0 }
 0x1c0   :  { %v261_v42 = vmax.f32 %v253_v40, 0.0 }
 0x1c2   :  { %v425_v43 = vpack.c.bf16 %v262_v41, %v261_v42 }
 0x1c4   :  { %427 = vmatpush3.bf16.msk.msra.mxu0 %vm426_vm7, %v425_v43 }
 0x1c7   :  { %412 = vmatmul.mubr.msk.f32.vlgmr.msra.gmra.mrb[4].mxu0 %vm270_vm8, %v263_v44 }
 0x29a   :  { %v344_v46 = vpop.f32.mrb[4].mxu0 }
 0x29b   :  { %v345_v47 = vadd.f32 %v344_v46, %v268_v45  ;;  %v413_v48 = vpop.f32.mrb[5].mxu0 }
 0x29d   :  { %349 = vst.msk [vmem:[#allocation2] sm:$0x3] %vm348_vm9, %v345_v47 }
 0x29e   :  { %447 = shalt.err (!%p444_p4)
}
 0x29f   :  { %s448_s29 = scalar_lea.hbm %s580_s7, 32 }
 0x2a0   :  { %p449_p5 = scmp.ne.s32.totalorder %s580_s7, %s448_s29  ;;  %p452_p6 = scmp.lt.u32.totalorder %s448_s29, %s580_s7 }
 0x2a2   :  { %p454_p7 = pnand %p452_p6, %p449_p5 }
 0x2a4   :  { %457 = shalt.err (!%p454_p7)
}
 0x2a5   :  { %359 = dma.vmem_to_hbm [thread:$0]  %s357_s26, 32, %s580_s7, [#allocation3]  }
 0x2a6   :  { %458 = dma.done.wait [#allocation3], 32  }
 0x2a7   :  { %459 = vsyncadd [#allocation3], 4294967264 }
 0x2a8   :  { %363 = vsyncpa [#allocation3], 1 }

</bundles_post_ra>
